<compile_context>
chip_gen: v6e
topology: v6e:2x2x1
jax: 0.10.0
libtpu: 0.0.40
codegen_flags: <defaults>
</compile_context>

<pallas_src>
import jax
import jax.numpy as jnp
import numpy as np
from jax import lax
from jax.experimental import pallas as pl
from jax.experimental.pallas import tpu as pltpu

T_IN = 8
T_OUT = 12
C_SP = 2  # spatial channels


# ---------------------------------------------------------------------------
# Pallas kernel
#   x_ref : (2, 8, TILE)   [input channel, time_in, ped]
#   w1_ref: (2, 32, 8)     stage-1 folded matrix, split along input channel;
#                          rows 0..15 = feat conv (banded), 16..31 = highway
#   b1_ref: (32, 1)
#   w2_ref: (2, 12, 16)    stage-2 folded matrix, one (12,16) per out channel
#   b2_ref: (2, 12, 1)
#   o_ref : (2, 12, TILE)  [output channel, time_out, ped]
# ---------------------------------------------------------------------------
def social_cell_local_kernel(x_ref, w1_ref, b1_ref, w2_ref, b2_ref, o_ref):
    f32 = jnp.float32

    # Stage 1: 3-tap time conv + 1x1 highway folded into one banded matrix,
    # contracted separately over the two input channels (no reshapes needed).
    s = (jnp.dot(w1_ref[0], x_ref[0], preferred_element_type=f32)
         + jnp.dot(w1_ref[1], x_ref[1], preferred_element_type=f32)
         + b1_ref[...])                                          # (32, TILE)
    # ReLU only on the feat half; highway half added raw.  Row splits are
    # sublane-tile aligned (0..15 / 16..31).
    h = jnp.maximum(s[:C_SP * T_IN], 0.0) + s[C_SP * T_IN:]      # (16, TILE)

    # Stage 2: temporal conv (+ folded 1x1 highway), one matmul per output
    # spatial channel, stored straight into the (2, 12, TILE) output block.
    for c in range(C_SP):
        y = jnp.dot(w2_ref[c], h, preferred_element_type=f32) + b2_ref[c]
        o_ref[c] = y.astype(o_ref.dtype)


# ---------------------------------------------------------------------------
# Host-side weight folding
# ---------------------------------------------------------------------------
def _pack_weights(p):
    f32 = jnp.float32
    feat_w = p['feat_w'].astype(f32)   # (2, 2, 3)
    feat_b = p['feat_b'].astype(f32)   # (2,)
    hwin_w = p['hwin_w'].astype(f32)   # (2, 2, 1)
    hwin_b = p['hwin_b'].astype(f32)   # (2,)
    hw_w = p['hw_w'].astype(f32)       # (12, 8, 1)
    hw_b = p['hw_b'].astype(f32)       # (12,)
    tp_w = p['tp_w'].astype(f32)       # (12, 8, 3)
    tp_b = p['tp_b'].astype(f32)       # (12,)

    # ---- Stage 1: banded time conv + identity highway, stacked -> (32, 16)
    t = jnp.arange(T_IN)
    diff = t[None, :] - t[:, None]                     # s - t
    band_mask = (jnp.abs(diff) <= 1)
    tap_idx = jnp.clip(diff + 1, 0, 2)                 # conv tap k = s - t + 1
    # feat_band[co, ci, t, s] = feat_w[co, ci, s - t + 1] inside the band
    feat_band = jnp.where(band_mask[None, None], feat_w[:, :, tap_idx], 0.0)
    feat_blk = jnp.transpose(feat_band, (0, 2, 1, 3)).reshape(C_SP * T_IN,
                                                              C_SP * T_IN)
    eye = jnp.eye(T_IN, dtype=f32)
    hw_band = hwin_w[:, :, 0][:, :, None, None] * eye[None, None]
    hw_blk = jnp.transpose(hw_band, (0, 2, 1, 3)).reshape(C_SP * T_IN,
                                                          C_SP * T_IN)
    w1 = jnp.concatenate([feat_blk, hw_blk], axis=0)                # (32, 16)
    # split the contraction axis per input channel -> (2, 32, 8)
    w1 = jnp.transpose(w1.reshape(2 * C_SP * T_IN, C_SP, T_IN), (1, 0, 2))
    b1 = jnp.concatenate([jnp.repeat(feat_b, T_IN),
                          jnp.repeat(hwin_b, T_IN)]).reshape(-1, 1)  # (32, 1)

    # ---- Stage 2: fold 1x1 highway into the centre tap of the 3-tap conv.
    wc = tp_w[:, :, 1] + hw_w[:, :, 0]                              # (12, 8)
    w2_c0 = jnp.concatenate([wc, tp_w[:, :, 2]], axis=1)            # out c=0
    w2_c1 = jnp.concatenate([tp_w[:, :, 0], wc], axis=1)            # out c=1
    w2 = jnp.stack([w2_c0, w2_c1], axis=0)                          # (2,12,16)
    b2 = jnp.tile((tp_b + hw_b).reshape(1, T_OUT, 1), (C_SP, 1, 1)) # (2,12,1)
    return w1, b1, w2, b2


def _round_up(x, m):
    return (x + m - 1) // m * m


def _choose_tile_n(B, N, cap=16384):
    tile = min(_round_up(N, 128), cap)
    # Keep >= 2 grid steps when there is enough work so the "parallel" grid
    # axes can shard across both TensorCores on megacore parts (v7x).
    if B == 1 and N > 128:
        tile = min(tile, _round_up(-(-N // 2), 128))
    return tile


# ---------------------------------------------------------------------------
# Wrapper: no transposes, no padding — native (B, 2, T, N) layout end to end.
# ---------------------------------------------------------------------------
def social_cell_local_pallas(v, params):
    """v: (B, 2, T_IN, N) float32 -> (B, 2, T_OUT, N) float32."""
    B, C, T, N = v.shape
    assert C == C_SP and T == T_IN
    v = v.astype(jnp.float32)

    w1, b1, w2, b2 = _pack_weights(params)
    tile_n = _choose_tile_n(B, N)
    grid = (B, pl.cdiv(N, tile_n))

    rows1 = 2 * C_SP * T_IN   # 32

    grid_spec = pltpu.PrefetchScalarGridSpec(
        num_scalar_prefetch=0,
        grid=grid,
        in_specs=[
            pl.BlockSpec((None, C_SP, T_IN, tile_n), lambda b, j: (b, 0, 0, j)),
            pl.BlockSpec((C_SP, rows1, T_IN), lambda b, j: (0, 0, 0)),
            pl.BlockSpec((rows1, 1), lambda b, j: (0, 0)),
            pl.BlockSpec((C_SP, T_OUT, C_SP * T_IN), lambda b, j: (0, 0, 0)),
            pl.BlockSpec((C_SP, T_OUT, 1), lambda b, j: (0, 0, 0)),
        ],
        out_specs=pl.BlockSpec((None, C_SP, T_OUT, tile_n),
                               lambda b, j: (b, 0, 0, j)),
    )

    return pl.pallas_call(
        social_cell_local_kernel,
        out_shape=jax.ShapeDtypeStruct((B, C_SP, T_OUT, N), jnp.float32),
        grid_spec=grid_spec,
        compiler_params=pltpu.CompilerParams(
            dimension_semantics=("parallel", "parallel")),
    )(v, w1, b1, w2, b2)
    # TODO(synk): optional bf16 I/O (input slab + output) would roughly halve
    # HBM bytes; kept f32 here to match the PyTorch module's dtype exactly.


# ---------------------------------------------------------------------------
# Pure-JAX reference mirroring the PyTorch module (for verification)
# ---------------------------------------------------------------------------
def _conv1d(x, w, b, pad):
    y = lax.conv_general_dilated(
        x, w, window_strides=(1,), padding=[(pad, pad)],
        dimension_numbers=('NCH', 'OIH', 'NCH'),
        precision=lax.Precision.HIGHEST)
    return y + b[None, :, None]


def ref_social_cell_local(v, p):
    B, C, T, N = v.shape
    x = jnp.transpose(v, (0, 3, 1, 2)).reshape(B * N, C, T)
    res = _conv1d(x, p['hwin_w'], p['hwin_b'], 0)
    h = jax.nn.relu(_conv1d(x, p['feat_w'], p['feat_b'], 1)) + res
    h = jnp.transpose(h, (0, 2, 1))
    res = _conv1d(h, p['hw_w'], p['hw_b'], 0)
    y = _conv1d(h, p['tp_w'], p['tp_b'], 1) + res
    y = jnp.transpose(y, (0, 2, 1)).reshape(B, N, C, T_OUT)
    return jnp.transpose(y, (0, 2, 3, 1))


# ---------------------------------------------------------------------------
# Deterministic parameter init (shapes per the PyTorch __init__)
# ---------------------------------------------------------------------------
def init_params(key):
    keys = jax.random.split(key, 8)

    def w(k, shape, scale=0.2):
        return (scale * jax.random.normal(k, shape)).astype(jnp.float32)

    return {
        'feat_w': w(keys[0], (C_SP, C_SP, 3)), 'feat_b': w(keys[1], (C_SP,), 0.1),
        'hwin_w': w(keys[2], (C_SP, C_SP, 1)), 'hwin_b': w(keys[3], (C_SP,), 0.1),
        'hw_w': w(keys[4], (T_OUT, T_IN, 1)), 'hw_b': w(keys[5], (T_OUT,), 0.1),
        'tp_w': w(keys[6], (T_OUT, T_IN, 3), 0.1), 'tp_b': w(keys[7], (T_OUT,), 0.1),
    }


if __name__ == "__main__":
    key = jax.random.PRNGKey(0)
    kv, kv2, kp = jax.random.split(key, 3)
    params = init_params(kp)

    # Case 1: small, N < 128 (partial lane block)
    batch, n_ped = 4, 32
    v = jax.random.normal(kv, (batch, C_SP, T_IN, n_ped), jnp.float32)
    out = jax.block_until_ready(social_cell_local_pallas(v, params))
    assert out.shape == (batch, C_SP, T_OUT, n_ped)
    ref = ref_social_cell_local(v, params)
    np.testing.assert_allclose(np.asarray(out), np.asarray(ref),
                               rtol=2e-3, atol=2e-3)

    # Case 2: N not a multiple of 128 (exercises masked partial block per batch)
    batch2, n_ped2 = 2, 200
    v2 = jax.random.normal(kv2, (batch2, C_SP, T_IN, n_ped2), jnp.float32)
    out2 = jax.block_until_ready(social_cell_local_pallas(v2, params))
    ref2 = ref_social_cell_local(v2, params)
    np.testing.assert_allclose(np.asarray(out2), np.asarray(ref2),
                               rtol=2e-3, atol=2e-3)

    print("KERNEL_OK")
</pallas_src>

<mosaic_0001>
module attributes {stable_mosaic.version = 11 : i64} {
  func.func @social_cell_local_kernel(%arg0: i32, %arg1: i32, %arg2: memref<1x2x8x128xf32, #tpu.memory_space<vmem>>, %arg3: memref<2x32x8xf32, #tpu.memory_space<vmem>>, %arg4: memref<32x1xf32, #tpu.memory_space<vmem>>, %arg5: memref<2x12x16xf32, #tpu.memory_space<vmem>>, %arg6: memref<2x12x1xf32, #tpu.memory_space<vmem>>, %arg7: memref<1x2x12x128xf32, #tpu.memory_space<vmem>>) attributes {dimension_semantics = [#tpu.dimension_semantics<parallel>, #tpu.dimension_semantics<parallel>], iteration_bounds = array<i64: 4, 1>, scalar_prefetch = 0 : i64, scratch_operands = 0 : i64, tpu.core_type = #tpu.core_type<tc>, window_params = [{transform_indices = @transform_0, window_bounds = array<i64: 1, 2, 8, 128>}, {pipeline_mode = #tpu.pipeline_mode<synchronous>, transform_indices = @transform_1, window_bounds = array<i64: 2, 32, 8>}, {pipeline_mode = #tpu.pipeline_mode<synchronous>, transform_indices = @transform_2, window_bounds = array<i64: 32, 1>}, {pipeline_mode = #tpu.pipeline_mode<synchronous>, transform_indices = @transform_3, window_bounds = array<i64: 2, 12, 16>}, {pipeline_mode = #tpu.pipeline_mode<synchronous>, transform_indices = @transform_4, window_bounds = array<i64: 2, 12, 1>}, {transform_indices = @transform_5, window_bounds = array<i64: 1, 2, 12, 128>}]} {
    %c0 = arith.constant 0 : index
    %c0_0 = arith.constant 0 : index
    %c0_1 = arith.constant 0 : index
    %0 = vector.load %arg3[%c0, %c0_0, %c0_1] : memref<2x32x8xf32, #tpu.memory_space<vmem>>, vector<1x32x8xf32>
    %1 = vector.shape_cast %0 : vector<1x32x8xf32> to vector<32x8xf32>
    %c0_2 = arith.constant 0 : index
    %c0_3 = arith.constant 0 : index
    %c0_4 = arith.constant 0 : index
    %c0_5 = arith.constant 0 : index
    %2 = vector.load %arg2[%c0_2, %c0_3, %c0_4, %c0_5] : memref<1x2x8x128xf32, #tpu.memory_space<vmem>>, vector<1x1x8x128xf32>
    %3 = vector.shape_cast %2 : vector<1x1x8x128xf32> to vector<8x128xf32>
    %cst = arith.constant dense<0.000000e+00> : vector<32x128xf32>
    %4 = tpu.matmul %1, %3, %cst {dimension_numbers = #tpu.dot_dimension_numbers<[1], [0], [0], [1], [0, 0, 1, 1], [], []>} : vector<32x8xf32>, vector<8x128xf32>, vector<32x128xf32> -> vector<32x128xf32>
    %c1 = arith.constant 1 : index
    %c0_6 = arith.constant 0 : index
    %c0_7 = arith.constant 0 : index
    %5 = vector.load %arg3[%c1, %c0_6, %c0_7] : memref<2x32x8xf32, #tpu.memory_space<vmem>>, vector<1x32x8xf32>
    %6 = vector.shape_cast %5 : vector<1x32x8xf32> to vector<32x8xf32>
    %c0_8 = arith.constant 0 : index
    %c1_9 = arith.constant 1 : index
    %c0_10 = arith.constant 0 : index
    %c0_11 = arith.constant 0 : index
    %7 = vector.load %arg2[%c0_8, %c1_9, %c0_10, %c0_11] : memref<1x2x8x128xf32, #tpu.memory_space<vmem>>, vector<1x1x8x128xf32>
    %8 = vector.shape_cast %7 : vector<1x1x8x128xf32> to vector<8x128xf32>
    %cst_12 = arith.constant dense<0.000000e+00> : vector<32x128xf32>
    %9 = tpu.matmul %6, %8, %cst_12 {dimension_numbers = #tpu.dot_dimension_numbers<[1], [0], [0], [1], [0, 0, 1, 1], [], []>} : vector<32x8xf32>, vector<8x128xf32>, vector<32x128xf32> -> vector<32x128xf32>
    %10 = arith.addf %4, %9 : vector<32x128xf32>
    %c0_13 = arith.constant 0 : index
    %c0_14 = arith.constant 0 : index
    %11 = vector.load %arg4[%c0_13, %c0_14] : memref<32x1xf32, #tpu.memory_space<vmem>>, vector<32x1xf32>
    %12 = vector.broadcast %11 : vector<32x1xf32> to vector<32x128xf32>
    %13 = arith.addf %10, %12 : vector<32x128xf32>
    %14 = vector.extract_strided_slice %13 {offsets = [0, 0], sizes = [16, 128], strides = [1, 1]} : vector<32x128xf32> to vector<16x128xf32>
    %cst_15 = arith.constant 0.000000e+00 : f32
    %15 = vector.broadcast %cst_15 : f32 to vector<16x128xf32>
    %16 = arith.maximumf %14, %15 : vector<16x128xf32>
    %17 = vector.extract_strided_slice %13 {offsets = [16, 0], sizes = [16, 128], strides = [1, 1]} : vector<32x128xf32> to vector<16x128xf32>
    %18 = arith.addf %16, %17 : vector<16x128xf32>
    %c0_16 = arith.constant 0 : index
    %c0_17 = arith.constant 0 : index
    %c0_18 = arith.constant 0 : index
    %19 = vector.load %arg5[%c0_16, %c0_17, %c0_18] : memref<2x12x16xf32, #tpu.memory_space<vmem>>, vector<1x12x16xf32>
    %20 = vector.shape_cast %19 : vector<1x12x16xf32> to vector<12x16xf32>
    %cst_19 = arith.constant dense<0.000000e+00> : vector<12x128xf32>
    %21 = tpu.matmul %20, %18, %cst_19 {dimension_numbers = #tpu.dot_dimension_numbers<[1], [0], [0], [1], [0, 0, 1, 1], [], []>} : vector<12x16xf32>, vector<16x128xf32>, vector<12x128xf32> -> vector<12x128xf32>
    %c0_20 = arith.constant 0 : index
    %c0_21 = arith.constant 0 : index
    %c0_22 = arith.constant 0 : index
    %22 = vector.load %arg6[%c0_20, %c0_21, %c0_22] : memref<2x12x1xf32, #tpu.memory_space<vmem>>, vector<1x12x1xf32>
    %23 = vector.shape_cast %22 : vector<1x12x1xf32> to vector<12x1xf32>
    %24 = vector.broadcast %23 : vector<12x1xf32> to vector<12x128xf32>
    %25 = arith.addf %21, %24 : vector<12x128xf32>
    %c0_23 = arith.constant 0 : index
    %c0_24 = arith.constant 0 : index
    %c0_25 = arith.constant 0 : index
    %c0_26 = arith.constant 0 : index
    %26 = vector.load %arg7[%c0_23, %c0_24, %c0_25, %c0_26] : memref<1x2x12x128xf32, #tpu.memory_space<vmem>>, vector<1x1x12x128xf32>
    %27 = vector.shape_cast %26 : vector<1x1x12x128xf32> to vector<12x128xf32>
    %28 = vector.shape_cast %25 : vector<12x128xf32> to vector<1x1x12x128xf32>
    tpu.vector_store %arg7[%c0_23, %c0_24, %c0_25, %c0_26], %28 {strides = array<i32>} : memref<1x2x12x128xf32, #tpu.memory_space<vmem>>, vector<1x1x12x128xf32>,
    %c1_27 = arith.constant 1 : index
    %c0_28 = arith.constant 0 : index
    %c0_29 = arith.constant 0 : index
    %29 = vector.load %arg5[%c1_27, %c0_28, %c0_29] : memref<2x12x16xf32, #tpu.memory_space<vmem>>, vector<1x12x16xf32>
    %30 = vector.shape_cast %29 : vector<1x12x16xf32> to vector<12x16xf32>
    %cst_30 = arith.constant dense<0.000000e+00> : vector<12x128xf32>
    %31 = tpu.matmul %30, %18, %cst_30 {dimension_numbers = #tpu.dot_dimension_numbers<[1], [0], [0], [1], [0, 0, 1, 1], [], []>} : vector<12x16xf32>, vector<16x128xf32>, vector<12x128xf32> -> vector<12x128xf32>
    %c1_31 = arith.constant 1 : index
    %c0_32 = arith.constant 0 : index
    %c0_33 = arith.constant 0 : index
    %32 = vector.load %arg6[%c1_31, %c0_32, %c0_33] : memref<2x12x1xf32, #tpu.memory_space<vmem>>, vector<1x12x1xf32>
    %33 = vector.shape_cast %32 : vector<1x12x1xf32> to vector<12x1xf32>
    %34 = vector.broadcast %33 : vector<12x1xf32> to vector<12x128xf32>
    %35 = arith.addf %31, %34 : vector<12x128xf32>
    %c0_34 = arith.constant 0 : index
    %c1_35 = arith.constant 1 : index
    %c0_36 = arith.constant 0 : index
    %c0_37 = arith.constant 0 : index
    %36 = vector.load %arg7[%c0_34, %c1_35, %c0_36, %c0_37] : memref<1x2x12x128xf32, #tpu.memory_space<vmem>>, vector<1x1x12x128xf32>
    %37 = vector.shape_cast %36 : vector<1x1x12x128xf32> to vector<12x128xf32>
    %38 = vector.shape_cast %35 : vector<12x128xf32> to vector<1x1x12x128xf32>
    tpu.vector_store %arg7[%c0_34, %c1_35, %c0_36, %c0_37], %38 {strides = array<i32>} : memref<1x2x12x128xf32, #tpu.memory_space<vmem>>, vector<1x1x12x128xf32>,
    return
  }
  func.func @transform_0(%arg0: i32, %arg1: i32) -> (i32, i32, i32, i32) {
    %c0_i32 = arith.constant 0 : i32
    %c0_i32_0 = arith.constant 0 : i32
    %c0_i32_1 = arith.constant 0 : i32
    return %arg0, %c0_i32, %c0_i32_0, %arg1 : i32, i32, i32, i32
  }
  func.func @transform_1(%arg0: i32, %arg1: i32) -> (i32, i32, i32) {
    %c0_i32 = arith.constant 0 : i32
    %c0_i32_0 = arith.constant 0 : i32
    %c0_i32_1 = arith.constant 0 : i32
    %c0_i32_2 = arith.constant 0 : i32
    return %c0_i32, %c0_i32_0, %c0_i32_1 : i32, i32, i32
  }
  func.func @transform_2(%arg0: i32, %arg1: i32) -> (i32, i32) {
    %c0_i32 = arith.constant 0 : i32
    %c0_i32_0 = arith.constant 0 : i32
    %c0_i32_1 = arith.constant 0 : i32
    return %c0_i32, %c0_i32_0 : i32, i32
  }
  func.func @transform_3(%arg0: i32, %arg1: i32) -> (i32, i32, i32) {
    %c0_i32 = arith.constant 0 : i32
    %c0_i32_0 = arith.constant 0 : i32
    %c0_i32_1 = arith.constant 0 : i32
    %c0_i32_2 = arith.constant 0 : i32
    return %c0_i32, %c0_i32_0, %c0_i32_1 : i32, i32, i32
  }
  func.func @transform_4(%arg0: i32, %arg1: i32) -> (i32, i32, i32) {
    %c0_i32 = arith.constant 0 : i32
    %c0_i32_0 = arith.constant 0 : i32
    %c0_i32_1 = arith.constant 0 : i32
    %c0_i32_2 = arith.constant 0 : i32
    return %c0_i32, %c0_i32_0, %c0_i32_1 : i32, i32, i32
  }
  func.func @transform_5(%arg0: i32, %arg1: i32) -> (i32, i32, i32, i32) {
    %c0_i32 = arith.constant 0 : i32
    %c0_i32_0 = arith.constant 0 : i32
    %c0_i32_1 = arith.constant 0 : i32
    return %arg0, %c0_i32, %c0_i32_0, %arg1 : i32, i32, i32, i32
  }
}

</mosaic_0001>

<bundles_post_ra>
// kernel: tpu_custom_call.1
= control target key start
LH: loop header
LB: loop body
LE: loop exit
PB: predicated region body
PF: predicated region fallthrough
CT: control target
= control target key end

     0   :  { %s942_s18 = smov 0   ;;  %s944_s19 = smov 0   ;;  %s1051_s0 = inlined_call_operand.vmem [shape: f32[4,2,8,32], index: 0, kind: input, shape index: {}]   ;;  %s1052_s1 = inlined_call_operand.vmem [shape: f32[2,32,8], index: 1, kind: input, shape index: {}]   ;;  %s1053_s2 = inlined_call_operand.vmem [shape: f32[32,1], index: 2, kind: input, shape index: {}]   ;;  %s1054_s3 = inlined_call_operand.vmem [shape: f32[2,12,16], index: 3, kind: input, shape index: {}]   ;;  %s1055_s4 = inlined_call_operand.vmem [shape: f32[2,12,1], index: 4, kind: input, shape index: {}]   ;;  %s1056_s5 = inlined_call_operand.vmem [shape: f32[4,2,12,32], index: 5, kind: output, shape index: {}]  }
   0x1   :  { %s946_s20 = smov 0  }
   0x2 LB: > { %s27_s21 = sadd.s32 1, %s905_s19  ;;  %p780_p0 = scmp.ge.s32.totalorder %s909_s20, 1  ;;  %s909_s20 = sphi %s946_s20, %s15_s20   ;;  %s905_s19 = sphi %s944_s19, %s1058_s19   ;;  %s901_s18 = sphi %s942_s18, %s1057_s18  }
   0x3   : > { %p29_p1 = scmp.ge.s32.totalorder %s27_s21, 4  ;;  %p206_p2 = scmp.lt.s32.totalorder %s909_s20, 5 }
   0x5   : > { %s1060_s21 = smov (%p29_p1, %s27_s21), 0  ;;  %p207_p3 = pnand %p780_p0, %p206_p2 }
   0x6   : > { %p240_p4 = scmp.lt.s32.totalorder (!%p207_p3), %s901_s18, 3 }
   0x7   : > { %210 = sbr.rel (%p207_p3) target bundleno = 423 (0x1a7), region = 40 }
   0xc   : > { %v785_v0 = vld [vmem:[%s1052_s1 + $0x20] sm:$0xff]  ;;  %vm268_vm0 = vcmask 64512   ;;  %s1062_s18 = smov (!%p240_p4, %s901_s18), 3  ;;  %v911_v2 = vmov 0   ;;  %v464_v3 = vld [vmem:[%s1053_s2 + $0x8] sm:$0xff]  ;;  %v466_v4 = vld [vmem:[%s1053_s2 + $0x18] sm:$0xff] }
   0xd   : > { %v256_v1 = vld [vmem:[%s1052_s1] sm:$0xff]  ;;  %832 = vmatprep.mubr.msk.f32.mxu0 %vm268_vm0, %v785_v0  ;;  %885 = vset.pattern.permute.xlu0 %v911_v2  ;;  %s810_s30 = sshll.u32 %s1062_s18, 4  ;;  %v786_v5 = vld [vmem:[%s1052_s1 + $0x28] sm:$0xff]  ;;  %v787_v9 = vld [vmem:[%s1052_s1 + $0x30] sm:$0xff]  ;;  %vm509_vm1 = vcmask 130048   ;;  %s811_s24 = sshll.u32 %s1062_s18, 5 }
   0xe   : > { %840 = vmatprep.mubr.msk.f32.mxu1 %vm268_vm0, %v256_v1  ;;  %886 = vset.pattern.permute.xlu1 %v911_v2  ;;  %s247_s8 = scalar_lea.vmem %s1051_s0, %s810_s30  ;;  %v257_v8 = vld [vmem:[%s1052_s1 + $0x8] sm:$0xff]  ;;  %v258_v10 = vld [vmem:[%s1052_s1 + $0x10] sm:$0xff]  ;;  %v463_v11 = vld [vmem:[%s1053_s2] sm:$0xff]  ;;  %s255_s27 = scalar_lea.vmem %s1056_s5, %s811_s24 }
   0xf   : > { %474 = vperm.xlu0 %885, %v464_v3   ;;  %484 = vperm.xlu1 %886, %v466_v4   ;;  %v789_v6 = vld [vmem:[%s247_s8 + $0x8] sm:$0xff]  ;;  %v260_v7 = vld [vmem:[%s247_s8] sm:$0xff]  ;;  %v465_v12 = vld [vmem:[%s1053_s2 + $0x10] sm:$0xff] }
  0x10   : > { %830 = vmatprep.subr.mxu0 %v789_v6  ;;  %838 = vmatprep.subr.mxu1 %v260_v7  ;;  %v788_v13 = vld [vmem:[%s1052_s1 + $0x38] sm:$0xff]  ;;  %v497_v15 = vld [vmem:[%s1055_s4] sm:$0xff]  ;;  %v498_v16 = vld [vmem:[%s1055_s4 + $0x8] sm:$0xf] }
  0x11   : > { %831 = vmatpush3.msra.mxu0 %v789_v6  ;;  %839 = vmatpush3.msra.mxu1 %v260_v7  ;;  %v259_v14 = vld [vmem:[%s1052_s1 + $0x18] sm:$0xff]  ;;  %v802_v17 = vld [vmem:[%s1055_s4 + $0x10] sm:$0xff]  ;;  %v495_v19 = vld [vmem:[%s1054_s3] sm:$0xff] }
  0x12   : > { %833 = vmatmul.mubr.msk.f32.vlgmr.msra.gmra.mxu0 %vm268_vm0, %v786_v5  ;;  %841 = vmatmul.mubr.msk.f32.vlgmr.msra.gmra.mxu1 %vm268_vm0, %v257_v8  ;;  %v803_v18 = vld [vmem:[%s1055_s4 + $0x18] sm:$0xf]  ;;  %v800_v20 = vld [vmem:[%s1054_s3 + $0x10] sm:$0xff]  ;;  %v496_v45 = vld [vmem:[%s1054_s3 + $0x8] sm:$0xf] }
  0x13   : > { %835 = vmatprep.mubr.msk.f32.mxu0 %vm268_vm0, %v787_v9  ;;  %843 = vmatprep.mubr.msk.f32.mxu1 %vm268_vm0, %v258_v10  ;;  %v801_v46 = vld [vmem:[%s1054_s3 + $0x18] sm:$0xf] }
  0x14   : > { %469 = vperm.xlu0 %885, %v463_v11   ;;  %479 = vperm.xlu1 %886, %v465_v12  }
  0x16   : > { %836 = vmatmul.mubr.msk.f32.gmra.mxu0 %vm268_vm0, %v788_v13  ;;  %844 = vmatmul.mubr.msk.f32.gmra.mxu1 %vm268_vm0, %v259_v14 }
  0x17   : > { %850 = vmatprep.mubr.msk.f32.mxu0 %vm509_vm1, %v495_v19  ;;  %857 = vmatprep.mubr.msk.f32.mxu1 %vm509_vm1, %v800_v20 }
  0x18   : > { %501 = vperm.xlu0 %885, %v497_v15   ;;  %506 = vperm.xlu1 %886, %v498_v16  }
  0x1c   : > { %601 = vperm.xlu0 %885, %v802_v17   ;;  %606 = vperm.xlu1 %886, %v803_v18  }
  0x8a   : > { %v475_v21 = vpop.permute.xlu0 %474  ;;  %v485_v24 = vpop.permute.xlu1 %484 }
  0x8f   : > { %v470_v28 = vpop.permute.xlu0 %469  ;;  %v480_v40 = vpop.permute.xlu1 %479 }
  0x93   : > { %v507_v47 = vpop.permute.xlu1 %506  ;;  %v502_v48 = vpop.permute.xlu0 %501 }
  0x97   : > { %v607_v49 = vpop.permute.xlu1 %606  ;;  %v602_v52 = vpop.permute.xlu0 %601 }
  0xd2   : > { %v834_v22 = vpop.f32.mrf.mxu0  ;;  %v842_v23 = vpop.f32.mrf.mxu1 }
  0xd3   : > { %v450_v25 = vadd.f32 %v842_v23, %v834_v22 }
  0xd4   : > { %v347_v26 = vpop.f32.mrf.mxu0  ;;  %v444_v27 = vpop.f32.mrf.mxu1 }
  0xd5   : > { %v488_v29 = vadd.f32 %v475_v21, %v450_v25  ;;  %v445_v30 = vadd.f32 %v444_v27, %v347_v26 }
  0xd6   : > { %v837_v31 = vpop.f32.mrf.mxu0  ;;  %v845_v32 = vpop.f32.mrf.mxu1 }
  0xd7   : > { %v487_v33 = vadd.f32 %v470_v28, %v445_v30  ;;  %v460_v34 = vadd.f32 %v845_v32, %v837_v31  ;;  %v492_v37 = vmax.f32 %v488_v29, 0.0 }
  0xd8   : > { %v357_v35 = vpop.f32.mrf.mxu0  ;;  %v454_v36 = vpop.f32.mrf.mxu1 }
  0xd9   : > { %v490_v38 = vadd.f32 %v485_v24, %v460_v34  ;;  %v455_v39 = vadd.f32 %v454_v36, %v357_v35  ;;  %v491_v41 = vmax.f32 %v487_v33, 0.0 }
  0xdb   : > { %v494_v42 = vadd.f32 %v492_v37, %v490_v38  ;;  %v489_v43 = vadd.f32 %v480_v40, %v455_v39 }
  0xdd   : > { %v493_v44 = vadd.f32 %v491_v41, %v489_v43  ;;  %846 = vmatprep.subr.mxu0 %v494_v42  ;;  %853 = vmatprep.subr.mxu1 %v494_v42 }
  0xde   : > { %847 = vmatpush3.msra.mxu0 %v494_v42  ;;  %854 = vmatpush3.msra.mxu1 %v494_v42 }
  0xdf   : > { %848 = vmatprep.subr.mxu0 %v493_v44  ;;  %855 = vmatprep.subr.mxu1 %v493_v44 }
  0xe0   : > { %849 = vmatpush3.msra.mxu0 %v493_v44  ;;  %856 = vmatpush3.msra.mxu1 %v493_v44 }
  0xe1   : > { %851 = vmatmul.mubr.msk.f32.vlgmr.msra.gmra.mxu0 %vm509_vm1, %v496_v45  ;;  %858 = vmatmul.mubr.msk.f32.vlgmr.msra.gmra.mxu1 %vm509_vm1, %v801_v46 }
 0x1a1   : > { %v852_v50 = vpop.f32.mrf.mxu0  ;;  %v859_v51 = vpop.f32.mrf.mxu1 }
 0x1a2   : > { %v588_v53 = vadd.f32 %v852_v50, %v507_v47  ;;  %v687_v54 = vadd.f32 %v859_v51, %v607_v49 }
 0x1a3   : > { %v582_v55 = vpop.f32.mrf.mxu0  ;;  %v681_v56 = vpop.f32.mrf.mxu1 }
 0x1a4   : > { %592 = vst [vmem:[%s255_s27 + $0x8] sm:$0xf] %v588_v53  ;;  %807 = vst [vmem:[%s255_s27 + $0x18] sm:$0xf] %v687_v54  ;;  %v583_v57 = vadd.f32 %v582_v55, %v502_v48  ;;  %v682_v58 = vadd.f32 %v681_v56, %v602_v52 }
 0x1a6   : > { %591 = vst [vmem:[%s255_s27] sm:$0xff] %v583_v57  ;;  %806 = vst [vmem:[%s255_s27 + $0x10] sm:$0xff] %v682_v58 }
 0x1a7 PF: > { %s15_s20 = sadd.s32 1, %s909_s20   ;;  %s1057_s18 = smov %s905_s19 }
 0x1a8   : > { %p12_p5 = scmp.ge.s32.totalorder %s15_s20, 6   ;;  %s1058_s19 = smov %s1060_s21 }
 0x1aa   :  { %14 = sbr.rel (!%p12_p5) target bundleno = 2 (0x2), region = 75 }

</bundles_post_ra>
